<compile_context>
chip_gen: v5e
topology: v5e:2x2
jax: 0.10.0
libtpu: 0.0.40
codegen_flags: <defaults>
</compile_context>

<pallas_src>
import jax
import jax.numpy as jnp
from jax.experimental import pallas as pl
from jax.experimental.pallas import tpu as pltpu


def _round_up(n, m):
    return ((n + m - 1) // m) * m


def _mlp_kernel(x_ref, w1_ref, b1_ref, w2_ref, b2_ref, w3_ref, b3_ref, o_ref):
    """One batch tile of the row-packed 3-layer MLP.

    Operands are "row packed": `pack` consecutive batch rows live in one matrix
    row, weights are block-diagonal (pack copies of the original weight) and
    biases are tiled, so every matmul, activation and store is lane-dense.
    """
    x = x_ref[...]

    # Layer 1: Linear + ReLU (MXU matmul, f32 accumulate; bias/ReLU on VPU).
    h1 = jnp.dot(x, w1_ref[...], preferred_element_type=jnp.float32)
    h1 = jnp.maximum(h1 + b1_ref[...], 0.0)

    # Layer 2: Linear + Sigmoid (sigmoid's exp/recip run on the EUP slot).
    h2 = jnp.dot(h1.astype(w2_ref.dtype), w2_ref[...],
                 preferred_element_type=jnp.float32)
    h2 = jax.nn.sigmoid(h2 + b2_ref[...])

    # Layer 3: Linear + Sigmoid, stored as a lane-dense (rows, pack*out) block
    # (pack*out == 128 here) -> unmasked vst + dense HBM writeback.
    h3 = jnp.dot(h2.astype(w3_ref.dtype), w3_ref[...],
                 preferred_element_type=jnp.float32)
    o_ref[...] = jax.nn.sigmoid(h3 + b3_ref[...]).astype(o_ref.dtype)


def attribute_network(x, w1, b1, w2, b2, w3, b3, *,
                      block_batch=8192, compute_dtype=jnp.bfloat16):
    """Forward pass of AttributeNetwork.

    x:  (B, input_size)  float32
    w1: (input_size, hidden1)   b1: (1, hidden1)  or (hidden1,)
    w2: (hidden1, hidden2)      b2: (1, hidden2)  or (hidden2,)
    w3: (hidden2, output_size)  b3: (1, output_size) or (output_size,)

    compute_dtype: matmul operand dtype (default bf16, native MXU path;
    accumulation is always f32). Use jnp.float32 for bit-tight checks.
    Returns float32 (B, output_size).
    """
    B, in_size = x.shape
    h2_size = w2.shape[1]
    out_size = w3.shape[1]

    if compute_dtype is None:
        compute_dtype = x.dtype

    # ---- Row-packing factor: make the kernel output row 128 lanes wide. ----
    if 0 < out_size <= 128 and 128 % out_size == 0:
        pack = 128 // out_size          # 8 for output_size=16
    else:
        pack = 1                        # degenerate (already wide) fallback
    unit = 8 * pack                     # batch-tile granularity (sublanes*pack)

    # ---- Batch-tile / grid selection ---------------------------------------
    # Large tiles amortize the ~0.35us/step overhead; keep tb derived from B so
    # mid-sized batches don't pad to a full block; keep num_tiles even so the
    # two v7x TensorCores split evenly (no-op on 1-TC v5e/v6e).
    rows = _round_up(B, unit)
    max_tb = max(unit, (block_batch // unit) * unit)   # stays far under VMEM caps
    num_tiles = pl.cdiv(rows, max_tb)
    if num_tiles == 1 and rows >= 2 * unit:
        num_tiles = 2                                  # let both v7x TCs work
    elif num_tiles > 1 and num_tiles % 2:
        num_tiles += 1
    tb = _round_up(pl.cdiv(rows, num_tiles), unit)     # minimal-pad tile size
    num_tiles = pl.cdiv(rows, tb)
    if num_tiles > 1 and num_tiles % 2:
        num_tiles += 1
    b_pad = num_tiles * tb
    tbp = tb // pack                                   # packed rows per tile

    # ---- Operand packing (one-time, cheap XLA ops in the wrapper) ----------
    # Block-diagonal weights: kron(I_pack, W) so the packed matmul computes
    # `pack` independent rows at once; biases are tiled to match.
    eye = jnp.eye(pack, dtype=jnp.float32)
    w1p = jnp.kron(eye, w1.astype(jnp.float32)).astype(compute_dtype)
    w2p = jnp.kron(eye, w2.astype(jnp.float32)).astype(compute_dtype)
    w3p = jnp.kron(eye, w3.astype(jnp.float32)).astype(compute_dtype)
    b1p = jnp.tile(b1.reshape(1, -1).astype(jnp.float32), (1, pack))
    b2p = jnp.tile(b2.reshape(1, -1).astype(jnp.float32), (1, pack))
    b3p = jnp.tile(b3.reshape(1, -1).astype(jnp.float32), (1, pack))

    xp = x.astype(compute_dtype)
    if b_pad != B:
        xp = jnp.pad(xp, ((0, b_pad - B), (0, 0)))
    # Contiguous row-major reshape: packs `pack` batch rows per matrix row.
    xp = xp.reshape(b_pad // pack, pack * in_size)

    # Weights/biases: whole-array blocks with constant index_maps -> DMA'd once
    # and VMEM-resident across every batch tile (~0.6 MB bf16 total here).
    def resident(a):
        nd = a.ndim
        return pl.BlockSpec(a.shape, lambda i: (0,) * nd)

    param_arrays = (w1p, b1p, w2p, b2p, w3p, b3p)
    cost = pl.CostEstimate(
        flops=2 * (b_pad // pack) * (w1p.size + w2p.size + w3p.size),
        transcendentals=b_pad * (h2_size + out_size),        # sigmoid exps
        bytes_accessed=int(xp.size * xp.dtype.itemsize
                           + sum(a.size * a.dtype.itemsize for a in param_arrays)
                           + b_pad * out_size * 4),
    )

    out = pl.pallas_call(
        _mlp_kernel,
        out_shape=jax.ShapeDtypeStruct((b_pad // pack, pack * out_size),
                                       jnp.float32),
        grid=(num_tiles,),
        in_specs=[
            # x: tiled on (packed) batch; double-buffered by the pipeline.
            pl.BlockSpec((tbp, pack * in_size), lambda i: (i, 0)),
            resident(w1p), resident(b1p),
            resident(w2p), resident(b2p),
            resident(w3p), resident(b3p),
        ],
        out_specs=pl.BlockSpec((tbp, pack * out_size), lambda i: (i, 0)),
        # "parallel" shards the batch axis across the 2 TCs on v7x (no-op on
        # v5e/v6e). If a trace shows it not sharding, switch to
        # pltpu.CORE_PARALLEL / pl.core_map.
        compiler_params=pltpu.CompilerParams(
            dimension_semantics=("parallel",)),
        cost_estimate=cost,
    )(xp, *param_arrays)

    # Contiguous reshape back to (b_pad, out_size); slice off padded rows.
    out = out.reshape(b_pad, out_size)
    if b_pad != B:
        out = out[:B]
    return out


def _init_params(key, input_size, hidden1, hidden2, output_size):
    """Deterministic parameter init (PyTorch-Linear-like uniform fan-in)."""
    keys = jax.random.split(key, 6)

    def lin(kw, kb, fan_in, fan_out):
        bound = 1.0 / jnp.sqrt(fan_in)
        w = jax.random.uniform(kw, (fan_in, fan_out), jnp.float32, -bound, bound)
        b = jax.random.uniform(kb, (1, fan_out), jnp.float32, -bound, bound)
        return w, b

    w1, b1 = lin(keys[0], keys[1], input_size, hidden1)
    w2, b2 = lin(keys[2], keys[3], hidden1, hidden2)
    w3, b3 = lin(keys[4], keys[5], hidden2, output_size)
    return w1, b1, w2, b2, w3, b3


def _reference(x, w1, b1, w2, b2, w3, b3):
    h = jnp.maximum(x @ w1 + b1, 0.0)
    h = jax.nn.sigmoid(h @ w2 + b2)
    return jax.nn.sigmoid(h @ w3 + b3)


if __name__ == "__main__":
    key = jax.random.PRNGKey(0)
    k_x1, k_x2, k_p = jax.random.split(key, 3)

    input_size, hidden1, hidden2, output_size = 32, 64, 32, 16
    params = _init_params(k_p, input_size, hidden1, hidden2, output_size)

    # --- Test 1: small batch (single tile), f32 operands, strict tolerance ---
    x_small = jax.random.normal(k_x1, (8, input_size), jnp.float32)
    out_small = jax.block_until_ready(
        attribute_network(x_small, *params, compute_dtype=jnp.float32))
    ref_small = _reference(x_small, *params)
    assert out_small.shape == (8, output_size)
    assert jnp.allclose(out_small, ref_small, atol=1e-5, rtol=1e-5)

    # --- Test 2: non-divisible batch -> exercises padding + even multi-tile
    #             grid (2 tiles) with resident packed weights, f32 strict -----
    x_big = jax.random.normal(k_x2, (1037, input_size), jnp.float32)
    out_big = jax.block_until_ready(
        attribute_network(x_big, *params, compute_dtype=jnp.float32))
    ref_big = _reference(x_big, *params)
    assert out_big.shape == (1037, output_size)
    assert jnp.allclose(out_big, ref_big, atol=1e-5, rtol=1e-5)

    # --- Test 3: default bf16 operand path (f32 accumulation), loose tol -----
    out_bf16 = jax.block_until_ready(attribute_network(x_big, *params))
    assert out_bf16.shape == (1037, output_size)
    assert jnp.allclose(out_bf16, ref_big, atol=2e-2, rtol=2e-2)

    print("KERNEL_OK")
</pallas_src>

<mosaic_0001>
module attributes {stable_mosaic.version = 11 : i64} {
  func.func @_mlp_kernel(%arg0: i32, %arg1: memref<8x256xf32, #tpu.memory_space<vmem>>, %arg2: memref<256x512xf32, #tpu.memory_space<vmem>>, %arg3: memref<1x512xf32, #tpu.memory_space<vmem>>, %arg4: memref<512x256xf32, #tpu.memory_space<vmem>>, %arg5: memref<1x256xf32, #tpu.memory_space<vmem>>, %arg6: memref<256x128xf32, #tpu.memory_space<vmem>>, %arg7: memref<1x128xf32, #tpu.memory_space<vmem>>, %arg8: memref<8x128xf32, #tpu.memory_space<vmem>>) attributes {dimension_semantics = [#tpu.dimension_semantics<parallel>], iteration_bounds = array<i64: 1>, scalar_prefetch = 0 : i64, scratch_operands = 0 : i64, tpu.core_type = #tpu.core_type<tc>, window_params = [{transform_indices = @transform_0, window_bounds = array<i64: 8, 256>}, {pipeline_mode = #tpu.pipeline_mode<synchronous>, transform_indices = @transform_1, window_bounds = array<i64: 256, 512>}, {pipeline_mode = #tpu.pipeline_mode<synchronous>, transform_indices = @transform_2, window_bounds = array<i64: 1, 512>}, {pipeline_mode = #tpu.pipeline_mode<synchronous>, transform_indices = @transform_3, window_bounds = array<i64: 512, 256>}, {pipeline_mode = #tpu.pipeline_mode<synchronous>, transform_indices = @transform_4, window_bounds = array<i64: 1, 256>}, {pipeline_mode = #tpu.pipeline_mode<synchronous>, transform_indices = @transform_5, window_bounds = array<i64: 256, 128>}, {pipeline_mode = #tpu.pipeline_mode<synchronous>, transform_indices = @transform_6, window_bounds = array<i64: 1, 128>}, {transform_indices = @transform_7, window_bounds = array<i64: 8, 128>}]} {
    %c0 = arith.constant 0 : index
    %c0_0 = arith.constant 0 : index
    %0 = vector.load %arg1[%c0, %c0_0] : memref<8x256xf32, #tpu.memory_space<vmem>>, vector<8x256xf32>
    %c0_1 = arith.constant 0 : index
    %c0_2 = arith.constant 0 : index
    %1 = vector.load %arg2[%c0_1, %c0_2] : memref<256x512xf32, #tpu.memory_space<vmem>>, vector<256x512xf32>
    %cst = arith.constant dense<0.000000e+00> : vector<8x512xf32>
    %2 = tpu.matmul %0, %1, %cst {dimension_numbers = #tpu.dot_dimension_numbers<[1], [0], [0], [1], [0, 0, 1, 1], [], []>} : vector<8x256xf32>, vector<256x512xf32>, vector<8x512xf32> -> vector<8x512xf32>
    %c0_3 = arith.constant 0 : index
    %c0_4 = arith.constant 0 : index
    %3 = vector.load %arg3[%c0_3, %c0_4] : memref<1x512xf32, #tpu.memory_space<vmem>>, vector<1x512xf32>
    %4 = vector.broadcast %3 : vector<1x512xf32> to vector<8x512xf32>
    %5 = arith.addf %2, %4 : vector<8x512xf32>
    %cst_5 = arith.constant 0.000000e+00 : f32
    %6 = vector.broadcast %cst_5 : f32 to vector<8x512xf32>
    %7 = arith.maximumf %5, %6 : vector<8x512xf32>
    %c0_6 = arith.constant 0 : index
    %c0_7 = arith.constant 0 : index
    %8 = vector.load %arg4[%c0_6, %c0_7] : memref<512x256xf32, #tpu.memory_space<vmem>>, vector<512x256xf32>
    %cst_8 = arith.constant dense<0.000000e+00> : vector<8x256xf32>
    %9 = tpu.matmul %7, %8, %cst_8 {dimension_numbers = #tpu.dot_dimension_numbers<[1], [0], [0], [1], [0, 0, 1, 1], [], []>} : vector<8x512xf32>, vector<512x256xf32>, vector<8x256xf32> -> vector<8x256xf32>
    %c0_9 = arith.constant 0 : index
    %c0_10 = arith.constant 0 : index
    %10 = vector.load %arg5[%c0_9, %c0_10] : memref<1x256xf32, #tpu.memory_space<vmem>>, vector<1x256xf32>
    %11 = vector.broadcast %10 : vector<1x256xf32> to vector<8x256xf32>
    %12 = arith.addf %9, %11 : vector<8x256xf32>
    %13 = arith.negf %12 : vector<8x256xf32>
    %14 = math.exp %13 : vector<8x256xf32>
    %cst_11 = arith.constant 1.000000e+00 : f32
    %15 = vector.broadcast %cst_11 : f32 to vector<8x256xf32>
    %16 = arith.addf %15, %14 : vector<8x256xf32>
    %17 = arith.divf %15, %16 : vector<8x256xf32>
    %c0_12 = arith.constant 0 : index
    %c0_13 = arith.constant 0 : index
    %18 = vector.load %arg6[%c0_12, %c0_13] : memref<256x128xf32, #tpu.memory_space<vmem>>, vector<256x128xf32>
    %cst_14 = arith.constant dense<0.000000e+00> : vector<8x128xf32>
    %19 = tpu.matmul %17, %18, %cst_14 {dimension_numbers = #tpu.dot_dimension_numbers<[1], [0], [0], [1], [0, 0, 1, 1], [], []>} : vector<8x256xf32>, vector<256x128xf32>, vector<8x128xf32> -> vector<8x128xf32>
    %c0_15 = arith.constant 0 : index
    %c0_16 = arith.constant 0 : index
    %20 = vector.load %arg7[%c0_15, %c0_16] : memref<1x128xf32, #tpu.memory_space<vmem>>, vector<1x128xf32>
    %21 = vector.broadcast %20 : vector<1x128xf32> to vector<8x128xf32>
    %22 = arith.addf %19, %21 : vector<8x128xf32>
    %23 = arith.negf %22 : vector<8x128xf32>
    %24 = math.exp %23 : vector<8x128xf32>
    %cst_17 = arith.constant 1.000000e+00 : f32
    %25 = vector.broadcast %cst_17 : f32 to vector<8x128xf32>
    %26 = arith.addf %25, %24 : vector<8x128xf32>
    %27 = arith.divf %25, %26 : vector<8x128xf32>
    %c0_18 = arith.constant 0 : index
    %c0_19 = arith.constant 0 : index
    %28 = vector.load %arg8[%c0_18, %c0_19] : memref<8x128xf32, #tpu.memory_space<vmem>>, vector<8x128xf32>
    tpu.vector_store %arg8[%c0_18, %c0_19], %27 {strides = array<i32>} : memref<8x128xf32, #tpu.memory_space<vmem>>, vector<8x128xf32>,
    return
  }
  func.func @transform_0(%arg0: i32) -> (i32, i32) {
    %c0_i32 = arith.constant 0 : i32
    %c0_i32_0 = arith.constant 0 : i32
    return %arg0, %c0_i32 : i32, i32
  }
  func.func @transform_1(%arg0: i32) -> (i32, i32) {
    %c0_i32 = arith.constant 0 : i32
    %c0_i32_0 = arith.constant 0 : i32
    %c0_i32_1 = arith.constant 0 : i32
    return %c0_i32, %c0_i32_0 : i32, i32
  }
  func.func @transform_2(%arg0: i32) -> (i32, i32) {
    %c0_i32 = arith.constant 0 : i32
    %c0_i32_0 = arith.constant 0 : i32
    %c0_i32_1 = arith.constant 0 : i32
    return %c0_i32, %c0_i32_0 : i32, i32
  }
  func.func @transform_3(%arg0: i32) -> (i32, i32) {
    %c0_i32 = arith.constant 0 : i32
    %c0_i32_0 = arith.constant 0 : i32
    %c0_i32_1 = arith.constant 0 : i32
    return %c0_i32, %c0_i32_0 : i32, i32
  }
  func.func @transform_4(%arg0: i32) -> (i32, i32) {
    %c0_i32 = arith.constant 0 : i32
    %c0_i32_0 = arith.constant 0 : i32
    %c0_i32_1 = arith.constant 0 : i32
    return %c0_i32, %c0_i32_0 : i32, i32
  }
  func.func @transform_5(%arg0: i32) -> (i32, i32) {
    %c0_i32 = arith.constant 0 : i32
    %c0_i32_0 = arith.constant 0 : i32
    %c0_i32_1 = arith.constant 0 : i32
    return %c0_i32, %c0_i32_0 : i32, i32
  }
  func.func @transform_6(%arg0: i32) -> (i32, i32) {
    %c0_i32 = arith.constant 0 : i32
    %c0_i32_0 = arith.constant 0 : i32
    %c0_i32_1 = arith.constant 0 : i32
    return %c0_i32, %c0_i32_0 : i32, i32
  }
  func.func @transform_7(%arg0: i32) -> (i32, i32) {
    %c0_i32 = arith.constant 0 : i32
    %c0_i32_0 = arith.constant 0 : i32
    return %arg0, %c0_i32 : i32, i32
  }
}

</mosaic_0001>

<bundles_post_ra>
// kernel: tpu_custom_call.1
= control target key start
LH: loop header
LB: loop body
LE: loop exit
PB: predicated region body
PF: predicated region fallthrough
CT: control target
= control target key end

     0   :  { %12 = vsyncpa [#allocation3], 0  ;;  %s1120_s0 = inlined_call_operand.hbm [shape: f32[8,256], index: 0, kind: input, shape index: {}]   ;;  %s1121_s1 = inlined_call_operand.hbm [shape: f32[256,512], index: 1, kind: input, shape index: {}]   ;;  %s1122_s2 = inlined_call_operand.hbm [shape: f32[1,512], index: 2, kind: input, shape index: {}]   ;;  %s1123_s3 = inlined_call_operand.hbm [shape: f32[512,256], index: 3, kind: input, shape index: {}]   ;;  %s1124_s4 = inlined_call_operand.vmem [shape: f32[1,256], index: 4, kind: input, shape index: {}]   ;;  %s1125_s5 = inlined_call_operand.hbm [shape: f32[256,128], index: 5, kind: input, shape index: {}]   ;;  %s1126_s6 = inlined_call_operand.vmem [shape: f32[1,128], index: 6, kind: input, shape index: {}]   ;;  %s1127_s7 = inlined_call_operand.hbm [shape: f32[8,128], index: 7, kind: output, shape index: {}]  }
   0x1   :  { %13 = vsyncpa [#allocation6], 0 }
   0x2   :  { %14 = vsyncpa [#allocation9], 0  ;;  %s31_s26 = sshll.u32 %s1121_s1, 4  ;;  %s32_s26 = int_to_ptr.hbm [resolvable:$true] %s31_s26 }
   0x3   :  { %15 = vsyncpa [#allocation4], 0  ;;  %s1032_s27 = smov [#allocation5]   ;;  %s55_s8 = sshll.u32 %s1123_s3, 4  ;;  %s56_s8 = int_to_ptr.hbm [resolvable:$true] %s55_s8 }
   0x4   :  { %s33_s28 = sshll.u32 %s1032_s27, 4  ;;  %s1033_s9 = smov 512   ;;  %s34_s28 = int_to_ptr.vmem [resolvable:$true] %s33_s28 }
   0x5   :  { %s1034_s10 = smov 32   ;;  %s1035_s11 = smov [#allocation8]  }
   0x6   :  { %39 = dma.hbm_to_vmem [thread:$0]  %s32_s26, 16384, %s34_s28, [#allocation6], %s1033_s9, %s1033_s9, %s1034_s10  }
   0x7   :  { %s57_s12 = sshll.u32 %s1035_s11, 4  ;;  %s1036_s13 = smov 256   ;;  %s58_s12 = int_to_ptr.vmem [resolvable:$true] %s57_s12 }
   0x8   :  { %s1037_s14 = smov 16   ;;  %s21_s16 = sshll.u32 %s1120_s0, 4  ;;  %s22_s16 = int_to_ptr.hbm [resolvable:$true] %s21_s16 }
   0x9   :  { %63 = dma.hbm_to_vmem [thread:$0]  %s56_s8, 16384, %s58_s12, [#allocation9], %s1036_s13, %s1036_s13, %s1037_s14  }
   0xa   :  { %s1038_s17 = smov [#allocation2]   ;;  %s45_s20 = sshll.u32 %s1122_s2, 4  ;;  %s46_s20 = int_to_ptr.hbm [resolvable:$true] %s45_s20 }
   0xb   :  { %s23_s18 = sshll.u32 %s1038_s17, 4  ;;  %s1039_s21 = smov [#allocation7]   ;;  %s24_s18 = int_to_ptr.vmem [resolvable:$true] %s23_s18 }
   0xc   :  { %26 = dma.hbm_to_vmem [thread:$0]  %s22_s16, 256, %s24_s18, [#allocation3]  }
   0xd   :  { %s47_s22 = sshll.u32 %s1039_s21, 4  ;;  %s70_s25 = sshll.u32 %s1125_s5, 4  ;;  %s48_s22 = int_to_ptr.vmem [resolvable:$true] %s47_s22  ;;  %s71_s25 = int_to_ptr.hbm [resolvable:$true] %s70_s25 }
   0xe   :  { %50 = dma.hbm_to_vmem [thread:$0]  %s46_s20, 64, %s48_s22, [#allocation6]  }
   0xf   :  { %s1040_s0 = smov [#allocation10]   ;;  %s1041_s27 = smov 128  }
  0x10   :  { %s72_s26 = sshll.u32 %s1040_s0, 4  ;;  %s1042_s28 = smov 8   ;;  %s73_s26 = int_to_ptr.vmem [resolvable:$true] %s72_s26 }
  0x11   :  { %78 = dma.hbm_to_vmem [thread:$0]  %s71_s25, 4096, %s73_s26, [#allocation9], %s1041_s27, %s1041_s27, %s1042_s28  }
  0x12   :  { %1024 = dma.done.wait [#allocation3], 256  }
  0x13   :  { %1025 = vsyncadd [#allocation3], 4294967040 }
  0x14   :  { %1026 = dma.done.wait [#allocation6], 16448  }
  0x15   :  { %1027 = vsyncadd [#allocation6], 4294950848 }
  0x16   :  { %1028 = dma.done.wait [#allocation9], 20480  }
  0x17   :  { %1029 = vsyncadd [#allocation9], 4294946816  ;;  %v163_v0 = vld [vmem:[#allocation5 + $0x1e0] sm:$0xff]  ;;  %v164_v1 = vld [vmem:[#allocation5 + $0x1e8] sm:$0xff]  ;;  %s1043_s30 = smov [#allocation11]   ;;  %s840_s10 = sshll.u32 %s1127_s7, 4  ;;  %s841_s10 = int_to_ptr.hbm [resolvable:$true] %s840_s10 }
  0x18   :  { %v159_v2 = vld [vmem:[#allocation5 + $0x1c0] sm:$0xff]  ;;  %241 = vmatpush.msra.mxu0 %v163_v0  ;;  %281 = vmatpush.msra.mxu2 %v164_v1  ;;  %v160_v4 = vld [vmem:[#allocation5 + $0x1c8] sm:$0xff]  ;;  %v165_v62 = vld [vmem:[#allocation5 + $0x1f0] sm:$0xff]  ;;  %s838_s8 = sshll.u32 %s1043_s30, 4  ;;  %s839_s8 = int_to_ptr.vmem [resolvable:$true] %s838_s8 }
  0x19   :  { %v227_v3 = vld [vmem:[#allocation5 + $0x3e0] sm:$0xff]  ;;  %v228_v5 = vld [vmem:[#allocation5 + $0x3e8] sm:$0xff]  ;;  %v166_v63 = vld [vmem:[#allocation5 + $0x1f8] sm:$0xff] }
  0x1a   :  { %261 = vmatpush.msra.mxu1 %v227_v3  ;;  %301 = vmatpush.msra.mxu3 %v228_v5  ;;  %v155_v6 = vld [vmem:[#allocation5 + $0x1a0] sm:$0xff]  ;;  %v156_v8 = vld [vmem:[#allocation5 + $0x1a8] sm:$0xff]  ;;  %v229_v3 = vld [vmem:[#allocation5 + $0x3f0] sm:$0xff] }
  0x1b   :  { %v223_v7 = vld [vmem:[#allocation5 + $0x3c0] sm:$0xff]  ;;  %242 = vmatpush.msra.mxu0 %v159_v2  ;;  %282 = vmatpush.msra.mxu2 %v160_v4  ;;  %v224_v9 = vld [vmem:[#allocation5 + $0x3c8] sm:$0xff]  ;;  %v161_v2 = vld [vmem:[#allocation5 + $0x1d0] sm:$0xff] }
  0x1c   :  { %v219_v10 = vld [vmem:[#allocation5 + $0x3a0] sm:$0xff]  ;;  %262 = vmatpush.msra.mxu1 %v223_v7  ;;  %302 = vmatpush.msra.mxu3 %v224_v9  ;;  %v152_v12 = vld [vmem:[#allocation5 + $0x188] sm:$0xff]  ;;  %v162_v4 = vld [vmem:[#allocation5 + $0x1d8] sm:$0xff] }
  0x1d   :  { %v151_v11 = vld [vmem:[#allocation5 + $0x180] sm:$0xff]  ;;  %v220_v13 = vld [vmem:[#allocation5 + $0x3a8] sm:$0xff]  ;;  %243 = vmatpush.msra.mxu0 %v155_v6  ;;  %283 = vmatpush.msra.mxu2 %v156_v8  ;;  %v230_v5 = vld [vmem:[#allocation5 + $0x3f8] sm:$0xff] }
  0x1e   :  { %v215_v14 = vld [vmem:[#allocation5 + $0x380] sm:$0xff]  ;;  %v216_v15 = vld [vmem:[#allocation5 + $0x388] sm:$0xff]  ;;  %263 = vmatpush.msra.mxu1 %v219_v10  ;;  %303 = vmatpush.msra.mxu3 %v220_v13  ;;  %v157_v6 = vld [vmem:[#allocation5 + $0x1b0] sm:$0xff] }
  0x1f   :  { %v147_v16 = vld [vmem:[#allocation5 + $0x160] sm:$0xff]  ;;  %v148_v17 = vld [vmem:[#allocation5 + $0x168] sm:$0xff]  ;;  %244 = vmatpush.msra.mxu0 %v151_v11  ;;  %284 = vmatpush.msra.mxu2 %v152_v12  ;;  %v225_v7 = vld [vmem:[#allocation5 + $0x3d0] sm:$0xff] }
  0x20   :  { %v211_v18 = vld [vmem:[#allocation5 + $0x360] sm:$0xff]  ;;  %v212_v19 = vld [vmem:[#allocation5 + $0x368] sm:$0xff]  ;;  %264 = vmatpush.msra.mxu1 %v215_v14  ;;  %304 = vmatpush.msra.mxu3 %v216_v15  ;;  %v158_v8 = vld [vmem:[#allocation5 + $0x1b8] sm:$0xff] }
  0x21   :  { %v143_v20 = vld [vmem:[#allocation5 + $0x140] sm:$0xff]  ;;  %v144_v21 = vld [vmem:[#allocation5 + $0x148] sm:$0xff]  ;;  %245 = vmatpush.msra.mxu0 %v147_v16  ;;  %285 = vmatpush.msra.mxu2 %v148_v17  ;;  %v226_v9 = vld [vmem:[#allocation5 + $0x3d8] sm:$0xff] }
  0x22   :  { %v207_v22 = vld [vmem:[#allocation5 + $0x340] sm:$0xff]  ;;  %v208_v23 = vld [vmem:[#allocation5 + $0x348] sm:$0xff]  ;;  %265 = vmatpush.msra.mxu1 %v211_v18  ;;  %305 = vmatpush.msra.mxu3 %v212_v19  ;;  %v153_v10 = vld [vmem:[#allocation5 + $0x190] sm:$0xff] }
  0x23   :  { %v139_v24 = vld [vmem:[#allocation5 + $0x120] sm:$0xff]  ;;  %v140_v25 = vld [vmem:[#allocation5 + $0x128] sm:$0xff]  ;;  %246 = vmatpush.msra.mxu0 %v143_v20  ;;  %286 = vmatpush.msra.mxu2 %v144_v21  ;;  %v221_v11 = vld [vmem:[#allocation5 + $0x3b0] sm:$0xff] }
  0x24   :  { %v203_v26 = vld [vmem:[#allocation5 + $0x320] sm:$0xff]  ;;  %v204_v27 = vld [vmem:[#allocation5 + $0x328] sm:$0xff]  ;;  %266 = vmatpush.msra.mxu1 %v207_v22  ;;  %306 = vmatpush.msra.mxu3 %v208_v23  ;;  %v154_v12 = vld [vmem:[#allocation5 + $0x198] sm:$0xff] }
  0x25   :  { %v135_v28 = vld [vmem:[#allocation5 + $0x100] sm:$0xff]  ;;  %v136_v29 = vld [vmem:[#allocation5 + $0x108] sm:$0xff]  ;;  %247 = vmatpush.msra.mxu0 %v139_v24  ;;  %287 = vmatpush.msra.mxu2 %v140_v25  ;;  %v222_v13 = vld [vmem:[#allocation5 + $0x3b8] sm:$0xff] }
  0x26   :  { %v199_v30 = vld [vmem:[#allocation5 + $0x300] sm:$0xff]  ;;  %v200_v31 = vld [vmem:[#allocation5 + $0x308] sm:$0xff]  ;;  %267 = vmatpush.msra.mxu1 %v203_v26  ;;  %307 = vmatpush.msra.mxu3 %v204_v27  ;;  %v149_v14 = vld [vmem:[#allocation5 + $0x170] sm:$0xff] }
  0x27   :  { %v131_v32 = vld [vmem:[#allocation5 + $0xe0] sm:$0xff]  ;;  %v132_v33 = vld [vmem:[#allocation5 + $0xe8] sm:$0xff]  ;;  %248 = vmatpush.msra.mxu0 %v135_v28  ;;  %288 = vmatpush.msra.mxu2 %v136_v29  ;;  %v217_v15 = vld [vmem:[#allocation5 + $0x390] sm:$0xff] }
  0x28   :  { %v195_v34 = vld [vmem:[#allocation5 + $0x2e0] sm:$0xff]  ;;  %v196_v35 = vld [vmem:[#allocation5 + $0x2e8] sm:$0xff]  ;;  %268 = vmatpush.msra.mxu1 %v199_v30  ;;  %308 = vmatpush.msra.mxu3 %v200_v31  ;;  %v150_v16 = vld [vmem:[#allocation5 + $0x178] sm:$0xff] }
  0x29   :  { %v127_v36 = vld [vmem:[#allocation5 + $0xc0] sm:$0xff]  ;;  %v128_v37 = vld [vmem:[#allocation5 + $0xc8] sm:$0xff]  ;;  %249 = vmatpush.msra.mxu0 %v131_v32  ;;  %289 = vmatpush.msra.mxu2 %v132_v33  ;;  %v218_v17 = vld [vmem:[#allocation5 + $0x398] sm:$0xff] }
  0x2a   :  { %v191_v38 = vld [vmem:[#allocation5 + $0x2c0] sm:$0xff]  ;;  %v192_v39 = vld [vmem:[#allocation5 + $0x2c8] sm:$0xff]  ;;  %269 = vmatpush.msra.mxu1 %v195_v34  ;;  %309 = vmatpush.msra.mxu3 %v196_v35  ;;  %v145_v18 = vld [vmem:[#allocation5 + $0x150] sm:$0xff] }
  0x2b   :  { %v123_v40 = vld [vmem:[#allocation5 + $0xa0] sm:$0xff]  ;;  %v124_v41 = vld [vmem:[#allocation5 + $0xa8] sm:$0xff]  ;;  %250 = vmatpush.msra.mxu0 %v127_v36  ;;  %290 = vmatpush.msra.mxu2 %v128_v37  ;;  %v213_v19 = vld [vmem:[#allocation5 + $0x370] sm:$0xff] }
  0x2c   :  { %v187_v42 = vld [vmem:[#allocation5 + $0x2a0] sm:$0xff]  ;;  %v188_v43 = vld [vmem:[#allocation5 + $0x2a8] sm:$0xff]  ;;  %270 = vmatpush.msra.mxu1 %v191_v38  ;;  %310 = vmatpush.msra.mxu3 %v192_v39  ;;  %v146_v20 = vld [vmem:[#allocation5 + $0x158] sm:$0xff] }
  0x2d   :  { %v119_v44 = vld [vmem:[#allocation5 + $0x80] sm:$0xff]  ;;  %v120_v45 = vld [vmem:[#allocation5 + $0x88] sm:$0xff]  ;;  %251 = vmatpush.msra.mxu0 %v123_v40  ;;  %291 = vmatpush.msra.mxu2 %v124_v41  ;;  %v214_v21 = vld [vmem:[#allocation5 + $0x378] sm:$0xff] }
  0x2e   :  { %v183_v46 = vld [vmem:[#allocation5 + $0x280] sm:$0xff]  ;;  %v184_v47 = vld [vmem:[#allocation5 + $0x288] sm:$0xff]  ;;  %271 = vmatpush.msra.mxu1 %v187_v42  ;;  %311 = vmatpush.msra.mxu3 %v188_v43  ;;  %v141_v22 = vld [vmem:[#allocation5 + $0x130] sm:$0xff] }
  0x2f   :  { %v115_v48 = vld [vmem:[#allocation5 + $0x60] sm:$0xff]  ;;  %v116_v49 = vld [vmem:[#allocation5 + $0x68] sm:$0xff]  ;;  %252 = vmatpush.msra.mxu0 %v119_v44  ;;  %292 = vmatpush.msra.mxu2 %v120_v45  ;;  %v209_v23 = vld [vmem:[#allocation5 + $0x350] sm:$0xff] }
  0x30   :  { %v179_v50 = vld [vmem:[#allocation5 + $0x260] sm:$0xff]  ;;  %v180_v51 = vld [vmem:[#allocation5 + $0x268] sm:$0xff]  ;;  %272 = vmatpush.msra.mxu1 %v183_v46  ;;  %312 = vmatpush.msra.mxu3 %v184_v47  ;;  %v142_v24 = vld [vmem:[#allocation5 + $0x138] sm:$0xff] }
  0x31   :  { %v111_v52 = vld [vmem:[#allocation5 + $0x40] sm:$0xff]  ;;  %v112_v53 = vld [vmem:[#allocation5 + $0x48] sm:$0xff]  ;;  %253 = vmatpush.msra.mxu0 %v115_v48  ;;  %293 = vmatpush.msra.mxu2 %v116_v49  ;;  %v210_v25 = vld [vmem:[#allocation5 + $0x358] sm:$0xff] }
  0x32   :  { %v175_v54 = vld [vmem:[#allocation5 + $0x240] sm:$0xff]  ;;  %v176_v55 = vld [vmem:[#allocation5 + $0x248] sm:$0xff]  ;;  %273 = vmatpush.msra.mxu1 %v179_v50  ;;  %313 = vmatpush.msra.mxu3 %v180_v51  ;;  %v137_v26 = vld [vmem:[#allocation5 + $0x110] sm:$0xff] }
  0x33   :  { %v107_v56 = vld [vmem:[#allocation5 + $0x20] sm:$0xff]  ;;  %v108_v57 = vld [vmem:[#allocation5 + $0x28] sm:$0xff]  ;;  %254 = vmatpush.msra.mxu0 %v111_v52  ;;  %294 = vmatpush.msra.mxu2 %v112_v53  ;;  %v205_v27 = vld [vmem:[#allocation5 + $0x330] sm:$0xff] }
  0x34   :  { %v171_v58 = vld [vmem:[#allocation5 + $0x220] sm:$0xff]  ;;  %v172_v59 = vld [vmem:[#allocation5 + $0x228] sm:$0xff]  ;;  %274 = vmatpush.msra.mxu1 %v175_v54  ;;  %314 = vmatpush.msra.mxu3 %v176_v55  ;;  %v138_v28 = vld [vmem:[#allocation5 + $0x118] sm:$0xff] }
  0x35   :  { %v103_v60 = vld [vmem:[#allocation5] sm:$0xff]  ;;  %v104_v61 = vld [vmem:[#allocation5 + $0x8] sm:$0xff]  ;;  %255 = vmatpush.msra.mxu0 %v107_v56  ;;  %295 = vmatpush.msra.mxu2 %v108_v57  ;;  %v206_v29 = vld [vmem:[#allocation5 + $0x338] sm:$0xff] }
  0x36   :  { %275 = vmatpush.msra.mxu1 %v171_v58  ;;  %315 = vmatpush.msra.mxu3 %v172_v59  ;;  %v167_v0 = vld [vmem:[#allocation5 + $0x200] sm:$0xff]  ;;  %v168_v1 = vld [vmem:[#allocation5 + $0x208] sm:$0xff]  ;;  %v1099_v30 = vld [vmem:[#allocation2] sm:$0xff] }
  0x37   :  { %256 = vmatpush.msra.mxu0 %v103_v60  ;;  %296 = vmatpush.msra.mxu2 %v104_v61  ;;  %v133_v31 = vld [vmem:[#allocation5 + $0xf0] sm:$0xff]  ;;  %v134_v33 = vld [vmem:[#allocation5 + $0xf8] sm:$0xff] }
  0x38   :  { %276 = vmatpush.msra.mxu1 %v167_v0  ;;  %316 = vmatpush.msra.mxu3 %v168_v1  ;;  %v201_v32 = vld [vmem:[#allocation5 + $0x310] sm:$0xff]  ;;  %v202_v34 = vld [vmem:[#allocation5 + $0x318] sm:$0xff] }
  0x39   :  { %321 = vmatpush.msrb.mxu0 %v165_v62  ;;  %361 = vmatpush.msrb.mxu2 %v166_v63  ;;  %v129_v35 = vld [vmem:[#allocation5 + $0xd0] sm:$0xff]  ;;  %v1102_v36 = vld [vmem:[#allocation2 + $0x8] sm:$0xff] }
  0x3a   :  { %341 = vmatpush.msrb.mxu1 %v229_v3  ;;  %381 = vmatpush.msrb.mxu3 %v230_v5  ;;  %v197_v37 = vld [vmem:[#allocation5 + $0x2f0] sm:$0xff]  ;;  %v130_v38 = vld [vmem:[#allocation5 + $0xd8] sm:$0xff] }
  0x3b   :  { %322 = vmatpush.msrb.mxu0 %v161_v2  ;;  %362 = vmatpush.msrb.mxu2 %v162_v4  ;;  %v198_v39 = vld [vmem:[#allocation5 + $0x2f8] sm:$0xff]  ;;  %v193_v40 = vld [vmem:[#allocation5 + $0x2d0] sm:$0xff] }
  0x3c   :  { %342 = vmatpush.msrb.mxu1 %v225_v7  ;;  %382 = vmatpush.msrb.mxu3 %v226_v9  ;;  %v125_v41 = vld [vmem:[#allocation5 + $0xb0] sm:$0xff]  ;;  %v126_v42 = vld [vmem:[#allocation5 + $0xb8] sm:$0xff]  ;;  %v465_v7 = vld [vmem:[#allocation8 + $0x1e0] sm:$0xff] }
  0x3d   :  { %323 = vmatpush.msrb.mxu0 %v157_v6  ;;  %363 = vmatpush.msrb.mxu2 %v158_v8  ;;  %v194_v43 = vld [vmem:[#allocation5 + $0x2d8] sm:$0xff]  ;;  %v121_v44 = vld [vmem:[#allocation5 + $0x90] sm:$0xff]  ;;  %v433_v6 = vld [vmem:[#allocation8 + $0xe0] sm:$0xff] }
  0x3e   :  { %343 = vmatpush.msrb.mxu1 %v221_v11  ;;  %383 = vmatpush.msrb.mxu3 %v222_v13  ;;  %v189_v45 = vld [vmem:[#allocation5 + $0x2b0] sm:$0xff]  ;;  %v122_v46 = vld [vmem:[#allocation5 + $0x98] sm:$0xff]  ;;  %v497_v8 = vld [vmem:[#allocation8 + $0x2e0] sm:$0xff] }
  0x3f   :  { %324 = vmatpush.msrb.mxu0 %v153_v10  ;;  %364 = vmatpush.msrb.mxu2 %v154_v12  ;;  %v190_v47 = vld [vmem:[#allocation5 + $0x2b8] sm:$0xff]  ;;  %v117_v48 = vld [vmem:[#allocation5 + $0x70] sm:$0xff]  ;;  %v529_v9 = vld [vmem:[#allocation8 + $0x3e0] sm:$0xff] }
  0x40   :  { %344 = vmatpush.msrb.mxu1 %v217_v15  ;;  %384 = vmatpush.msrb.mxu3 %v218_v17  ;;  %v185_v49 = vld [vmem:[#allocation5 + $0x290] sm:$0xff]  ;;  %v118_v50 = vld [vmem:[#allocation5 + $0x78] sm:$0xff]  ;;  %v461_v15 = vld [vmem:[#allocation8 + $0x1c0] sm:$0xff] }
  0x41   :  { %325 = vmatpush.msrb.mxu0 %v149_v14  ;;  %365 = vmatpush.msrb.mxu2 %v150_v16  ;;  %v186_v51 = vld [vmem:[#allocation5 + $0x298] sm:$0xff]  ;;  %v113_v52 = vld [vmem:[#allocation5 + $0x50] sm:$0xff]  ;;  %v429_v14 = vld [vmem:[#allocation8 + $0xc0] sm:$0xff] }
  0x42   :  { %345 = vmatpush.msrb.mxu1 %v213_v19  ;;  %385 = vmatpush.msrb.mxu3 %v214_v21  ;;  %v181_v53 = vld [vmem:[#allocation5 + $0x270] sm:$0xff]  ;;  %v114_v54 = vld [vmem:[#allocation5 + $0x58] sm:$0xff]  ;;  %v493_v16 = vld [vmem:[#allocation8 + $0x2c0] sm:$0xff] }
  0x43   :  { %326 = vmatpush.msrb.mxu0 %v145_v18  ;;  %366 = vmatpush.msrb.mxu2 %v146_v20  ;;  %v182_v55 = vld [vmem:[#allocation5 + $0x278] sm:$0xff]  ;;  %v109_v56 = vld [vmem:[#allocation5 + $0x30] sm:$0xff]  ;;  %v525_v17 = vld [vmem:[#allocation8 + $0x3c0] sm:$0xff] }
  0x44   :  { %346 = vmatpush.msrb.mxu1 %v209_v23  ;;  %386 = vmatpush.msrb.mxu3 %v210_v25  ;;  %v177_v57 = vld [vmem:[#allocation5 + $0x250] sm:$0xff]  ;;  %v110_v58 = vld [vmem:[#allocation5 + $0x38] sm:$0xff]  ;;  %v457_v23 = vld [vmem:[#allocation8 + $0x1a0] sm:$0xff] }
  0x45   :  { %327 = vmatpush.msrb.mxu0 %v141_v22  ;;  %367 = vmatpush.msrb.mxu2 %v142_v24  ;;  %v178_v59 = vld [vmem:[#allocation5 + $0x258] sm:$0xff]  ;;  %v105_v60 = vld [vmem:[#allocation5 + $0x10] sm:$0xff]  ;;  %v425_v22 = vld [vmem:[#allocation8 + $0xa0] sm:$0xff] }
  0x46   :  { %347 = vmatpush.msrb.mxu1 %v205_v27  ;;  %387 = vmatpush.msrb.mxu3 %v206_v29  ;;  %v173_v61 = vld [vmem:[#allocation5 + $0x230] sm:$0xff]  ;;  %v106_v62 = vld [vmem:[#allocation5 + $0x18] sm:$0xff]  ;;  %v489_v24 = vld [vmem:[#allocation8 + $0x2a0] sm:$0xff] }
  0x47   :  { %328 = vmatpush.msrb.mxu0 %v137_v26  ;;  %368 = vmatpush.msrb.mxu2 %v138_v28  ;;  %v174_v63 = vld [vmem:[#allocation5 + $0x238] sm:$0xff]  ;;  %v169_v0 = vld [vmem:[#allocation5 + $0x210] sm:$0xff]  ;;  %v521_v25 = vld [vmem:[#allocation8 + $0x3a0] sm:$0xff] }
  0x48   :  { %297 = vmatmul.f32.vlgmr.msra.gmra.mxu2 %v1099_v30  ;;  %348 = vmatpush.msrb.mxu1 %v201_v32  ;;  %v170_v1 = vld [vmem:[#allocation5 + $0x218] sm:$0xff]  ;;  %v485_v32 = vld [vmem:[#allocation8 + $0x280] sm:$0xff] }
  0x49   :  { %329 = vmatpush.msrb.mxu0 %v133_v31  ;;  %369 = vmatpush.msrb.mxu2 %v134_v33  ;;  %v435_v2 = vld [vmem:[#allocation8 + $0xf0] sm:$0xff]  ;;  %v453_v31 = vld [vmem:[#allocation8 + $0x180] sm:$0xff] }
  0x4a   :  { %388 = vmatpush.msrb.mxu3 %v202_v34  ;;  %349 = vmatpush.msrb.mxu1 %v197_v37  ;;  %v467_v3 = vld [vmem:[#allocation8 + $0x1f0] sm:$0xff]  ;;  %v517_v33 = vld [vmem:[#allocation8 + $0x380] sm:$0xff] }
  0x4b   :  { %330 = vmatpush.msrb.mxu0 %v129_v35  ;;  %317 = vmatmul.f32.vlgmr.msra.gmra.mxu3 %v1102_v36  ;;  %v499_v4 = vld [vmem:[#allocation8 + $0x2f0] sm:$0xff] }
  0x4c   :  { %370 = vmatpush.msrb.mxu2 %v130_v38  ;;  %389 = vmatpush.msrb.mxu3 %v198_v39  ;;  %v531_v5 = vld [vmem:[#allocation8 + $0x3f0] sm:$0xff]  ;;  %v417_v38 = vld [vmem:[#allocation8 + $0x60] sm:$0xff] }
  0x4d   :  { %257 = vmatmul.f32.vlgmr.msra.gmra.mxu0 %v1099_v30  ;;  %350 = vmatpush.msrb.mxu1 %v193_v40  ;;  %v431_v10 = vld [vmem:[#allocation8 + $0xd0] sm:$0xff]  ;;  %v449_v39 = vld [vmem:[#allocation8 + $0x160] sm:$0xff] }
  0x4e   :  { %331 = vmatpush.msrb.mxu0 %v125_v41  ;;  %371 = vmatpush.msrb.mxu2 %v126_v42  ;;  %v463_v11 = vld [vmem:[#allocation8 + $0x1d0] sm:$0xff]  ;;  %v481_v40 = vld [vmem:[#allocation8 + $0x260] sm:$0xff] }
  0x4f   :  { %390 = vmatpush.msrb.mxu3 %v194_v43  ;;  %277 = vmatmul.f32.vlgmr.msra.gmra.mxu1 %v1102_v36  ;;  %v495_v12 = vld [vmem:[#allocation8 + $0x2d0] sm:$0xff]  ;;  %v513_v41 = vld [vmem:[#allocation8 + $0x360] sm:$0xff] }
  0x50   :  { %332 = vmatpush.msrb.mxu0 %v121_v44  ;;  %351 = vmatpush.msrb.mxu1 %v189_v45  ;;  %v527_v13 = vld [vmem:[#allocation8 + $0x3d0] sm:$0xff] }
  0x51   :  { %372 = vmatpush.msrb.mxu2 %v122_v46  ;;  %391 = vmatpush.msrb.mxu3 %v190_v47  ;;  %v427_v18 = vld [vmem:[#allocation8 + $0xb0] sm:$0xff]  ;;  %v413_v46 = vld [vmem:[#allocation8 + $0x40] sm:$0xff] }
  0x52   :  { %333 = vmatpush.msrb.mxu0 %v117_v48  ;;  %352 = vmatpush.msrb.mxu1 %v185_v49  ;;  %v459_v19 = vld [vmem:[#allocation8 + $0x1b0] sm:$0xff]  ;;  %v445_v47 = vld [vmem:[#allocation8 + $0x140] sm:$0xff] }
  0x53   :  { %373 = vmatpush.msrb.mxu2 %v118_v50  ;;  %392 = vmatpush.msrb.mxu3 %v186_v51  ;;  %v491_v20 = vld [vmem:[#allocation8 + $0x2b0] sm:$0xff]  ;;  %v477_v48 = vld [vmem:[#allocation8 + $0x240] sm:$0xff] }
  0x54   :  { %334 = vmatpush.msrb.mxu0 %v113_v52  ;;  %353 = vmatpush.msrb.mxu1 %v181_v53  ;;  %v523_v21 = vld [vmem:[#allocation8 + $0x3b0] sm:$0xff]  ;;  %v509_v49 = vld [vmem:[#allocation8 + $0x340] sm:$0xff] }
  0x55   :  { %374 = vmatpush.msrb.mxu2 %v114_v54  ;;  %393 = vmatpush.msrb.mxu3 %v182_v55  ;;  %v423_v26 = vld [vmem:[#allocation8 + $0x90] sm:$0xff]  ;;  %v409_v54 = vld [vmem:[#allocation8 + $0x20] sm:$0xff] }
  0x56   :  { %335 = vmatpush.msrb.mxu0 %v109_v56  ;;  %354 = vmatpush.msrb.mxu1 %v177_v57  ;;  %v455_v27 = vld [vmem:[#allocation8 + $0x190] sm:$0xff]  ;;  %v441_v55 = vld [vmem:[#allocation8 + $0x120] sm:$0xff] }
  0x57   :  { %375 = vmatpush.msrb.mxu2 %v110_v58  ;;  %394 = vmatpush.msrb.mxu3 %v178_v59  ;;  %v487_v28 = vld [vmem:[#allocation8 + $0x290] sm:$0xff]  ;;  %v473_v56 = vld [vmem:[#allocation8 + $0x220] sm:$0xff] }
  0x58   :  { %336 = vmatpush.msrb.mxu0 %v105_v60  ;;  %355 = vmatpush.msrb.mxu1 %v173_v61  ;;  %v519_v29 = vld [vmem:[#allocation8 + $0x390] sm:$0xff]  ;;  %v505_v57 = vld [vmem:[#allocation8 + $0x320] sm:$0xff] }
  0x59   :  { %376 = vmatpush.msrb.mxu2 %v106_v62  ;;  %395 = vmatpush.msrb.mxu3 %v174_v63  ;;  %v419_v34 = vld [vmem:[#allocation8 + $0x70] sm:$0xff]  ;;  %v405_v62 = vld [vmem:[#allocation8] sm:$0xff] }
  0x5a   :  { %337 = vmatmul.f32.vlgmr.msrb.gmra.mxu0 %v1099_v30  ;;  %377 = vmatmul.f32.vlgmr.msrb.gmra.mxu2 %v1099_v30  ;;  %v421_v30 = vld [vmem:[#allocation8 + $0x80] sm:$0xff]  ;;  %v451_v35 = vld [vmem:[#allocation8 + $0x170] sm:$0xff] }
  0x5b   :  { %356 = vmatpush.msrb.mxu1 %v169_v0  ;;  %396 = vmatpush.msrb.mxu3 %v170_v1  ;;  %v515_v37 = vld [vmem:[#allocation8 + $0x370] sm:$0xff]  ;;  %v437_v63 = vld [vmem:[#allocation8 + $0x100] sm:$0xff]  ;;  %v436_v0 = vld [vmem:[#allocation8 + $0xf8] sm:$0xff] }
  0x5c   :  { %357 = vmatmul.f32.vlgmr.msrb.gmra.mxu1 %v1102_v36  ;;  %397 = vmatmul.f32.vlgmr.msrb.gmra.mxu3 %v1102_v36  ;;  %v483_v36 = vld [vmem:[#allocation8 + $0x270] sm:$0xff]  ;;  %v468_v1 = vld [vmem:[#allocation8 + $0x1f8] sm:$0xff] }
  0x5d   :  { %539 = vmatpush.msra.mxu0 %v435_v2  ;;  %559 = vmatpush.msra.mxu1 %v467_v3  ;;  %v415_v42 = vld [vmem:[#allocation8 + $0x50] sm:$0xff]  ;;  %v469_v2 = vld [vmem:[#allocation8 + $0x200] sm:$0xff]  ;;  %v434_v3 = vld [vmem:[#allocation8 + $0xe8] sm:$0xff] }
  0x5e   :  { %579 = vmatpush.msra.mxu2 %v499_v4  ;;  %599 = vmatpush.msra.mxu3 %v531_v5  ;;  %v447_v43 = vld [vmem:[#allocation8 + $0x150] sm:$0xff]  ;;  %v466_v4 = vld [vmem:[#allocation8 + $0x1e8] sm:$0xff]  ;;  %v500_v5 = vld [vmem:[#allocation8 + $0x2f8] sm:$0xff] }
  0x5f   :  { %540 = vmatpush.msra.mxu0 %v433_v6  ;;  %560 = vmatpush.msra.mxu1 %v465_v7  ;;  %v479_v44 = vld [vmem:[#allocation8 + $0x250] sm:$0xff]  ;;  %v432_v6 = vld [vmem:[#allocation8 + $0xd8] sm:$0xff] }
  0x60   :  { %580 = vmatpush.msra.mxu2 %v497_v8  ;;  %600 = vmatpush.msra.mxu3 %v529_v9  ;;  %v511_v45 = vld [vmem:[#allocation8 + $0x350] sm:$0xff]  ;;  %v464_v7 = vld [vmem:[#allocation8 + $0x1d8] sm:$0xff]  ;;  %v498_v8 = vld [vmem:[#allocation8 + $0x2e8] sm:$0xff] }
  0x61   :  { %541 = vmatpush.msra.mxu0 %v431_v10  ;;  %561 = vmatpush.msra.mxu1 %v463_v11  ;;  %v411_v50 = vld [vmem:[#allocation8 + $0x30] sm:$0xff]  ;;  %v430_v9 = vld [vmem:[#allocation8 + $0xc8] sm:$0xff]  ;;  %v428_v11 = vld [vmem:[#allocation8 + $0xb8] sm:$0xff] }
  0x62   :  { %581 = vmatpush.msra.mxu2 %v495_v12  ;;  %601 = vmatpush.msra.mxu3 %v527_v13  ;;  %v443_v51 = vld [vmem:[#allocation8 + $0x130] sm:$0xff]  ;;  %v462_v10 = vld [vmem:[#allocation8 + $0x1c8] sm:$0xff]  ;;  %v460_v12 = vld [vmem:[#allocation8 + $0x1b8] sm:$0xff] }
  0x63   :  { %542 = vmatpush.msra.mxu0 %v429_v14  ;;  %562 = vmatpush.msra.mxu1 %v461_v15  ;;  %v475_v52 = vld [vmem:[#allocation8 + $0x230] sm:$0xff]  ;;  %v426_v13 = vld [vmem:[#allocation8 + $0xa8] sm:$0xff]  ;;  %v424_v15 = vld [vmem:[#allocation8 + $0x98] sm:$0xff] }
  0x64   :  { %582 = vmatpush.msra.mxu2 %v493_v16  ;;  %602 = vmatpush.msra.mxu3 %v525_v17  ;;  %v507_v53 = vld [vmem:[#allocation8 + $0x330] sm:$0xff]  ;;  %v458_v14 = vld [vmem:[#allocation8 + $0x1a8] sm:$0xff]  ;;  %v456_v16 = vld [vmem:[#allocation8 + $0x198] sm:$0xff] }
  0x65   :  { %543 = vmatpush.msra.mxu0 %v427_v18  ;;  %563 = vmatpush.msra.mxu1 %v459_v19  ;;  %v407_v58 = vld [vmem:[#allocation8 + $0x10] sm:$0xff]  ;;  %v422_v17 = vld [vmem:[#allocation8 + $0x88] sm:$0xff]  ;;  %v420_v18 = vld [vmem:[#allocation8 + $0x78] sm:$0xff] }
  0x66   :  { %583 = vmatpush.msra.mxu2 %v491_v20  ;;  %603 = vmatpush.msra.mxu3 %v523_v21  ;;  %v439_v59 = vld [vmem:[#allocation8 + $0x110] sm:$0xff]  ;;  %v454_v19 = vld [vmem:[#allocation8 + $0x188] sm:$0xff]  ;;  %v496_v20 = vld [vmem:[#allocation8 + $0x2d8] sm:$0xff] }
  0x67   :  { %544 = vmatpush.msra.mxu0 %v425_v22  ;;  %564 = vmatpush.msra.mxu1 %v457_v23  ;;  %v471_v60 = vld [vmem:[#allocation8 + $0x210] sm:$0xff]  ;;  %v501_v21 = vld [vmem:[#allocation8 + $0x300] sm:$0xff]  ;;  %v418_v22 = vld [vmem:[#allocation8 + $0x68] sm:$0xff] }
  0x68   :  { %584 = vmatpush.msra.mxu2 %v489_v24  ;;  %604 = vmatpush.msra.mxu3 %v521_v25  ;;  %v503_v61 = vld [vmem:[#allocation8 + $0x310] sm:$0xff]  ;;  %v452_v23 = vld [vmem:[#allocation8 + $0x178] sm:$0xff]  ;;  %v494_v24 = vld [vmem:[#allocation8 + $0x2c8] sm:$0xff] }
  0x69   :  { %545 = vmatpush.msra.mxu0 %v423_v26  ;;  %565 = vmatpush.msra.mxu1 %v455_v27  ;;  %v532_v25 = vld [vmem:[#allocation8 + $0x3f8] sm:$0xff]  ;;  %v450_v27 = vld [vmem:[#allocation8 + $0x168] sm:$0xff] }
  0x6a   :  { %585 = vmatpush.msra.mxu2 %v487_v28  ;;  %605 = vmatpush.msra.mxu3 %v519_v29  ;;  %v416_v26 = vld [vmem:[#allocation8 + $0x58] sm:$0xff]  ;;  %v530_v29 = vld [vmem:[#allocation8 + $0x3e8] sm:$0xff] }
  0x6b   :  { %546 = vmatpush.msra.mxu0 %v421_v30  ;;  %566 = vmatpush.msra.mxu1 %v453_v31  ;;  %v492_v28 = vld [vmem:[#allocation8 + $0x2b8] sm:$0xff]  ;;  %v414_v30 = vld [vmem:[#allocation8 + $0x48] sm:$0xff] }
  0x6c   :  { %586 = vmatpush.msra.mxu2 %v485_v32  ;;  %606 = vmatpush.msra.mxu3 %v517_v33  ;;  %v448_v31 = vld [vmem:[#allocation8 + $0x158] sm:$0xff]  ;;  %v490_v32 = vld [vmem:[#allocation8 + $0x2a8] sm:$0xff] }
  0x6d   :  { %547 = vmatpush.msra.mxu0 %v419_v34  ;;  %567 = vmatpush.msra.mxu1 %v451_v35  ;;  %v528_v33 = vld [vmem:[#allocation8 + $0x3d8] sm:$0xff]  ;;  %v446_v35 = vld [vmem:[#allocation8 + $0x148] sm:$0xff] }
  0x6e   :  { %587 = vmatpush.msra.mxu2 %v483_v36  ;;  %607 = vmatpush.msra.mxu3 %v515_v37  ;;  %v412_v34 = vld [vmem:[#allocation8 + $0x38] sm:$0xff]  ;;  %v526_v37 = vld [vmem:[#allocation8 + $0x3c8] sm:$0xff] }
  0x6f   :  { %548 = vmatpush.msra.mxu0 %v417_v38  ;;  %568 = vmatpush.msra.mxu1 %v449_v39  ;;  %v488_v36 = vld [vmem:[#allocation8 + $0x298] sm:$0xff]  ;;  %v410_v38 = vld [vmem:[#allocation8 + $0x28] sm:$0xff] }
  0x70   :  { %588 = vmatpush.msra.mxu2 %v481_v40  ;;  %608 = vmatpush.msra.mxu3 %v513_v41  ;;  %v444_v39 = vld [vmem:[#allocation8 + $0x138] sm:$0xff]  ;;  %v486_v40 = vld [vmem:[#allocation8 + $0x288] sm:$0xff] }
  0x71   :  { %549 = vmatpush.msra.mxu0 %v415_v42  ;;  %569 = vmatpush.msra.mxu1 %v447_v43  ;;  %v524_v41 = vld [vmem:[#allocation8 + $0x3b8] sm:$0xff]  ;;  %v442_v43 = vld [vmem:[#allocation8 + $0x128] sm:$0xff] }
  0x72   :  { %589 = vmatpush.msra.mxu2 %v479_v44  ;;  %609 = vmatpush.msra.mxu3 %v511_v45  ;;  %v408_v42 = vld [vmem:[#allocation8 + $0x18] sm:$0xff]  ;;  %v522_v45 = vld [vmem:[#allocation8 + $0x3a8] sm:$0xff] }
  0x73   :  { %550 = vmatpush.msra.mxu0 %v413_v46  ;;  %570 = vmatpush.msra.mxu1 %v445_v47  ;;  %v484_v44 = vld [vmem:[#allocation8 + $0x278] sm:$0xff]  ;;  %v406_v46 = vld [vmem:[#allocation8 + $0x8] sm:$0xff] }
  0x74   :  { %590 = vmatpush.msra.mxu2 %v477_v48  ;;  %610 = vmatpush.msra.mxu3 %v509_v49  ;;  %v440_v47 = vld [vmem:[#allocation8 + $0x118] sm:$0xff]  ;;  %v482_v48 = vld [vmem:[#allocation8 + $0x268] sm:$0xff] }
  0x75   :  { %551 = vmatpush.msra.mxu0 %v411_v50  ;;  %571 = vmatpush.msra.mxu1 %v443_v51  ;;  %v520_v49 = vld [vmem:[#allocation8 + $0x398] sm:$0xff]  ;;  %v438_v50 = vld [vmem:[#allocation8 + $0x108] sm:$0xff] }
  0x76   :  { %591 = vmatpush.msra.mxu2 %v475_v52  ;;  %611 = vmatpush.msra.mxu3 %v507_v53  ;;  %v480_v51 = vld [vmem:[#allocation8 + $0x258] sm:$0xff]  ;;  %v518_v52 = vld [vmem:[#allocation8 + $0x388] sm:$0xff] }
  0x77   :  { %552 = vmatpush.msra.mxu0 %v409_v54  ;;  %572 = vmatpush.msra.mxu1 %v441_v55  ;;  %v478_v53 = vld [vmem:[#allocation8 + $0x248] sm:$0xff]  ;;  %v516_v54 = vld [vmem:[#allocation8 + $0x378] sm:$0xff] }
  0x78   :  { %592 = vmatpush.msra.mxu2 %v473_v56  ;;  %612 = vmatpush.msra.mxu3 %v505_v57  ;;  %v476_v55 = vld [vmem:[#allocation8 + $0x238] sm:$0xff]  ;;  %v514_v56 = vld [vmem:[#allocation8 + $0x368] sm:$0xff] }
  0x79   :  { %553 = vmatpush.msra.mxu0 %v407_v58  ;;  %573 = vmatpush.msra.mxu1 %v439_v59  ;;  %v474_v57 = vld [vmem:[#allocation8 + $0x228] sm:$0xff]  ;;  %v512_v58 = vld [vmem:[#allocation8 + $0x358] sm:$0xff] }
  0x7a   :  { %593 = vmatpush.msra.mxu2 %v471_v60  ;;  %613 = vmatpush.msra.mxu3 %v503_v61  ;;  %v472_v59 = vld [vmem:[#allocation8 + $0x218] sm:$0xff]  ;;  %v510_v60 = vld [vmem:[#allocation8 + $0x348] sm:$0xff] }
  0x7b   :  { %554 = vmatpush.msra.mxu0 %v405_v62  ;;  %574 = vmatpush.msra.mxu1 %v437_v63  ;;  %v231_v61 = vld [vmem:[#allocation7] sm:$0xf]  ;;  %v470_v62 = vld [vmem:[#allocation8 + $0x208] sm:$0xff] }
  0x7c   :  { %594 = vmatpush.msra.mxu2 %v469_v2  ;;  %614 = vmatpush.msra.mxu3 %v501_v21  ;;  %v508_v63 = vld [vmem:[#allocation8 + $0x338] sm:$0xff] }
  0x7d   :  { %619 = vmatpush.msrb.mxu0 %v436_v0  ;;  %639 = vmatpush.msrb.mxu1 %v468_v1  ;;  %v506_v0 = vld [vmem:[#allocation8 + $0x328] sm:$0xff]  ;;  %v233_v1 = vperm.slane %v231_v61, 0  ;;  %v504_v2 = vld [vmem:[#allocation8 + $0x318] sm:$0xff] }
  0x7e   :  { %659 = vmatpush.msrb.mxu2 %v500_v5  ;;  %679 = vmatpush.msrb.mxu3 %v532_v25 }
  0x7f   :  { %620 = vmatpush.msrb.mxu0 %v434_v3  ;;  %640 = vmatpush.msrb.mxu1 %v466_v4  ;;  %v234_v3 = vperm.slane %v231_v61, 1  ;;  %v502_v4 = vld [vmem:[#allocation8 + $0x308] sm:$0xff] }
  0x80   :  { %660 = vmatpush.msrb.mxu2 %v498_v8  ;;  %680 = vmatpush.msrb.mxu3 %v530_v29  ;;  %v750_v29 = vld [vmem:[#allocation10 + $0x68] sm:$0xff] }
  0x81   :  { %621 = vmatpush.msrb.mxu0 %v432_v6  ;;  %641 = vmatpush.msrb.mxu1 %v464_v7 }
  0x82   :  { %661 = vmatpush.msrb.mxu2 %v496_v20  ;;  %681 = vmatpush.msrb.mxu3 %v528_v33  ;;  %v236_v20 = vperm.slane %v231_v61, 3  ;;  %v747_v33 = vld [vmem:[#allocation10 + $0x50] sm:$0xff] }
  0x83   :  { %622 = vmatpush.msrb.mxu0 %v430_v9  ;;  %642 = vmatpush.msrb.mxu1 %v462_v10 }
  0x84   :  { %662 = vmatpush.msrb.mxu2 %v494_v24  ;;  %682 = vmatpush.msrb.mxu3 %v526_v37  ;;  %v745_v37 = vld [vmem:[#allocation10 + $0x40] sm:$0xff] }
  0x85   :  { %623 = vmatpush.msrb.mxu0 %v428_v11  ;;  %643 = vmatpush.msrb.mxu1 %v460_v12 }
  0x86   :  { %663 = vmatpush.msrb.mxu2 %v492_v28  ;;  %683 = vmatpush.msrb.mxu3 %v524_v41  ;;  %v751_v28 = vld [vmem:[#allocation10 + $0x70] sm:$0xff] }
  0x87   :  { %624 = vmatpush.msrb.mxu0 %v426_v13  ;;  %644 = vmatpush.msrb.mxu1 %v458_v14  ;;  %v743_v41 = vld [vmem:[#allocation10 + $0x30] sm:$0xff] }
  0x88   :  { %664 = vmatpush.msrb.mxu2 %v490_v32  ;;  %684 = vmatpush.msrb.mxu3 %v522_v45  ;;  %v768_v32 = vld [vmem:[#allocation10 + $0xf8] sm:$0xff]  ;;  %v762_v45 = vld [vmem:[#allocation10 + $0xc8] sm:$0xff] }
  0x89   :  { %625 = vmatpush.msrb.mxu0 %v424_v15  ;;  %645 = vmatpush.msrb.mxu1 %v456_v16  ;;  %v235_v15 = vperm.slane %v231_v61, 2 }
  0x8a   :  { %665 = vmatpush.msrb.mxu2 %v488_v36  ;;  %685 = vmatpush.msrb.mxu3 %v520_v49  ;;  %v766_v36 = vld [vmem:[#allocation10 + $0xe8] sm:$0xff]  ;;  %v761_v49 = vld [vmem:[#allocation10 + $0xc0] sm:$0xff] }
  0x8b   :  { %626 = vmatpush.msrb.mxu0 %v422_v17  ;;  %646 = vmatpush.msrb.mxu1 %v454_v19 }
  0x8c   :  { %666 = vmatpush.msrb.mxu2 %v486_v40  ;;  %686 = vmatpush.msrb.mxu3 %v518_v52  ;;  %v764_v40 = vld [vmem:[#allocation10 + $0xd8] sm:$0xff]  ;;  %v739_v52 = vld [vmem:[#allocation10 + $0x10] sm:$0xff] }
  0x8d   :  { %627 = vmatpush.msrb.mxu0 %v420_v18  ;;  %647 = vmatpush.msrb.mxu1 %v452_v23 }
  0x8e   :  { %667 = vmatpush.msrb.mxu2 %v484_v44  ;;  %687 = vmatpush.msrb.mxu3 %v516_v54  ;;  %v742_v44 = vld [vmem:[#allocation10 + $0x28] sm:$0xff] }
  0x8f   :  { %628 = vmatpush.msrb.mxu0 %v418_v22  ;;  %648 = vmatpush.msrb.mxu1 %v450_v27  ;;  %v752_v27 = vld [vmem:[#allocation10 + $0x78] sm:$0xff] }
  0x90   :  { %668 = vmatpush.msrb.mxu2 %v482_v48  ;;  %688 = vmatpush.msrb.mxu3 %v514_v56  ;;  %v741_v48 = vld [vmem:[#allocation10 + $0x20] sm:$0xff]  ;;  %v738_v56 = vld [vmem:[#allocation10 + $0x8] sm:$0xff] }
  0x91   :  { %629 = vmatpush.msrb.mxu0 %v416_v26  ;;  %649 = vmatpush.msrb.mxu1 %v448_v31  ;;  %v748_v31 = vld [vmem:[#allocation10 + $0x58] sm:$0xff] }
  0x92   :  { %669 = vmatpush.msrb.mxu2 %v480_v51  ;;  %689 = vmatpush.msrb.mxu3 %v512_v58  ;;  %v760_v51 = vld [vmem:[#allocation10 + $0xb8] sm:$0xff] }
  0x93   :  { %630 = vmatpush.msrb.mxu0 %v414_v30  ;;  %650 = vmatpush.msrb.mxu1 %v446_v35  ;;  %v749_v30 = vld [vmem:[#allocation10 + $0x60] sm:$0xff]  ;;  %v746_v35 = vld [vmem:[#allocation10 + $0x48] sm:$0xff] }
  0x94   :  { %670 = vmatpush.msrb.mxu2 %v478_v53  ;;  %690 = vmatpush.msrb.mxu3 %v510_v60  ;;  %v759_v53 = vld [vmem:[#allocation10 + $0xb0] sm:$0xff]  ;;  %v757_v60 = vld [vmem:[#allocation10 + $0xa0] sm:$0xff] }
  0x95   :  { %631 = vmatpush.msrb.mxu0 %v412_v34  ;;  %651 = vmatpush.msrb.mxu1 %v444_v39  ;;  %v767_v34 = vld [vmem:[#allocation10 + $0xf0] sm:$0xff]  ;;  %v744_v39 = vld [vmem:[#allocation10 + $0x38] sm:$0xff] }
  0x96   :  { %671 = vmatpush.msrb.mxu2 %v476_v55  ;;  %691 = vmatpush.msrb.mxu3 %v508_v63 }
  0x97   :  { %632 = vmatpush.msrb.mxu0 %v410_v38  ;;  %652 = vmatpush.msrb.mxu1 %v442_v43  ;;  %v765_v38 = vld [vmem:[#allocation10 + $0xe0] sm:$0xff]  ;;  %v533_v43 = vld [vmem:[%s1124_s4] sm:$0x3] }
  0x98   :  { %672 = vmatpush.msrb.mxu2 %v474_v57  ;;  %692 = vmatpush.msrb.mxu3 %v506_v0  ;;  %v758_v57 = vld [vmem:[#allocation10 + $0xa8] sm:$0xff] }
  0x99   :  { %633 = vmatpush.msrb.mxu0 %v408_v42  ;;  %653 = vmatpush.msrb.mxu1 %v440_v47  ;;  %v763_v42 = vld [vmem:[#allocation10 + $0xd0] sm:$0xff]  ;;  %v535_v47 = vperm.slane %v533_v43, 0 }
  0x9a   :  { %673 = vmatpush.msrb.mxu2 %v472_v59  ;;  %693 = vmatpush.msrb.mxu3 %v504_v2  ;;  %v737_v59 = vld [vmem:[#allocation10] sm:$0xff]  ;;  %v755_v2 = vld [vmem:[#allocation10 + $0x90] sm:$0xff] }
  0x9b   :  { %634 = vmatpush.msrb.mxu0 %v406_v46  ;;  %654 = vmatpush.msrb.mxu1 %v438_v50  ;;  %v740_v50 = vld [vmem:[#allocation10 + $0x18] sm:$0xff] }
  0x9c   :  { %674 = vmatpush.msrb.mxu2 %v470_v62  ;;  %694 = vmatpush.msrb.mxu3 %v502_v4  ;;  %v536_v62 = vperm.slane %v533_v43, 1 }
  0xca   :  { %v258_v5 = vpop.f32.mrf.mxu0 }
  0xcb   :  { %v259_v6 = vadd.f32 %v258_v5, %v233_v1  ;;  %v298_v7 = vpop.f32.mrf.mxu2  ;;  %v756_v1 = vld [vmem:[#allocation10 + $0x98] sm:$0xff] }
  0xcc   :  { %v278_v8 = vpop.f32.mrf.mxu1  ;;  %v299_v9 = vadd.f32 %v298_v7, %v234_v3 }
  0xcd   :  { %v279_v10 = vadd.f32 %v278_v8, %v259_v6  ;;  %v754_v6 = vld [vmem:[#allocation10 + $0x88] sm:$0xff] }
  0xce   :  { %v318_v11 = vpop.f32.mrf.mxu3 }
  0xcf   :  { %v401_v12 = vmax.f32 %v279_v10, 0.0  ;;  %v319_v13 = vadd.f32 %v318_v11, %v299_v9  ;;  %v753_v9 = vld [vmem:[#allocation10 + $0x80] sm:$0xff] }
  0xd1   :  { %v402_v14 = vmax.f32 %v319_v13, 0.0  ;;  %555 = vmatmul.f32.vlgmr.msra.gmra.mxu0 %v401_v12 }
  0xd2   :  { %773 = vmatpush.msra.mxu0 %v752_v27 }
  0xd3   :  { %575 = vmatmul.f32.vlgmr.msra.gmra.mxu1 %v402_v14 }
  0xd4   :  { %774 = vmatpush.msra.mxu0 %v751_v28  ;;  %793 = vmatpush.msra.mxu1 %v768_v32 }
  0xd6   :  { %775 = vmatpush.msra.mxu0 %v750_v29  ;;  %794 = vmatpush.msra.mxu1 %v767_v34 }
  0xd7   :  { %v338_v16 = vpop.f32.mrf.mxu0 }
  0xd8   :  { %v339_v17 = vadd.f32 %v338_v16, %v235_v15  ;;  %776 = vmatpush.msra.mxu0 %v749_v30  ;;  %795 = vmatpush.msra.mxu1 %v766_v36 }
  0xd9   :  { %v358_v18 = vpop.f32.mrf.mxu1  ;;  %635 = vmatmul.f32.vlgmr.msrb.gmra.mxu0 %v401_v12 }
  0xda   :  { %v359_v19 = vadd.f32 %v358_v18, %v339_v17  ;;  %777 = vmatpush.msra.mxu0 %v748_v31  ;;  %796 = vmatpush.msra.mxu1 %v765_v38 }
  0xdb   :  { %655 = vmatmul.f32.vlgmr.msrb.gmra.mxu1 %v402_v14 }
  0xdc   :  { %v403_v21 = vmax.f32 %v359_v19, 0.0  ;;  %778 = vmatpush.msra.mxu0 %v747_v33  ;;  %797 = vmatpush.msra.mxu1 %v764_v40  ;;  %v867_v40 = vld [vmem:[%s1126_s6] ss:$0 sm:$0xff] }
  0xdd   :  { %v378_v22 = vpop.f32.mrf.mxu2 }
  0xde   :  { %v379_v23 = vadd.f32 %v378_v22, %v236_v20  ;;  %595 = vmatmul.f32.vlgmr.msra.gmra.mxu2 %v403_v21  ;;  %779 = vmatpush.msra.mxu0 %v746_v35 }
  0xdf   :  { %v398_v24 = vpop.f32.mrf.mxu3  ;;  %798 = vmatpush.msra.mxu1 %v763_v42 }
  0xe0   :  { %v399_v25 = vadd.f32 %v398_v24, %v379_v23  ;;  %780 = vmatpush.msra.mxu0 %v745_v37 }
  0xe1   :  { %799 = vmatpush.msra.mxu1 %v762_v45 }
  0xe2   :  { %v404_v26 = vmax.f32 %v399_v25, 0.0  ;;  %781 = vmatpush.msra.mxu0 %v744_v39 }
  0xe3   :  { %800 = vmatpush.msra.mxu1 %v761_v49 }
  0xe4   :  { %615 = vmatmul.f32.vlgmr.msra.gmra.mxu3 %v404_v26  ;;  %782 = vmatpush.msra.mxu0 %v743_v41 }
  0xe5   :  { %801 = vmatpush.msra.mxu1 %v760_v51 }
  0xe6   :  { %675 = vmatmul.f32.vlgmr.msrb.gmra.mxu2 %v403_v21  ;;  %783 = vmatpush.msra.mxu0 %v742_v44 }
  0xe7   :  { %802 = vmatpush.msra.mxu1 %v759_v53 }
  0xe8   :  { %784 = vmatpush.msra.mxu0 %v741_v48 }
  0xe9   :  { %803 = vmatpush.msra.mxu1 %v758_v57 }
  0xea   :  { %785 = vmatpush.msra.mxu0 %v740_v50 }
  0xeb   :  { %804 = vmatpush.msra.mxu1 %v757_v60 }
  0xec   :  { %695 = vmatmul.f32.vlgmr.msrb.gmra.mxu3 %v404_v26  ;;  %786 = vmatpush.msra.mxu0 %v739_v52 }
  0xed   :  { %805 = vmatpush.msra.mxu1 %v756_v1 }
  0xee   :  { %787 = vmatpush.msra.mxu0 %v738_v56 }
  0xef   :  { %806 = vmatpush.msra.mxu1 %v755_v2 }
  0xf0   :  { %788 = vmatpush.msra.mxu0 %v737_v59 }
  0xf1   :  { %807 = vmatpush.msra.mxu1 %v754_v6 }
  0xf3   :  { %808 = vmatpush.msra.mxu1 %v753_v9 }
 0x14e   :  { %v556_v46 = vpop.f32.mrf.mxu0 }
 0x14f   :  { %v557_v55 = vadd.f32 %v556_v46, %v535_v47 }
 0x150   :  { %v576_v54 = vpop.f32.mrf.mxu1 }
 0x151   :  { %v577_v61 = vadd.f32 %v576_v54, %v557_v55 }
 0x156   :  { %v636_v63 = vpop.f32.mrf.mxu0 }
 0x157   :  { %v637_v4 = vadd.f32 %v636_v63, %v536_v62 }
 0x158   :  { %v656_v7 = vpop.f32.mrf.mxu1 }
 0x159   :  { %v657_v11 = vadd.f32 %v656_v7, %v637_v4 }
 0x161   :  { %v596_v58 = vpop.f32.mrf.mxu2 }
 0x162   :  { %v597_v0 = vadd.f32 %v596_v58, %v577_v61 }
 0x167   :  { %v616_v3 = vpop.f32.mrf.mxu3 }
 0x168   :  { %v617_v5 = vadd.f32 %v616_v3, %v597_v0 }
 0x169   :  { %v676_v10 = vpop.f32.mrf.mxu2 }
 0x16a   :  { %v852_v8 = vmul.f32 -1.442695, %v617_v5  ;;  %v677_v12 = vadd.f32 %v676_v10, %v657_v11 }
 0x16c   :  { %868 = vpow2.f32 %v852_v8 }
 0x16f   :  { %v696_v13 = vpop.f32.mrf.mxu3 }
 0x170   :  { %v697_v14 = vadd.f32 %v696_v13, %v677_v12 }
 0x172   :  { %v869_v15 = vpop.eup %868  ;;  %v853_v16 = vmul.f32 -1.442695, %v697_v14 }
 0x173   :  { %v705_v17 = vadd.f32 1.0, %v869_v15 }
 0x174   :  { %870 = vpow2.f32 %v853_v16 }
 0x175   :  { %872 = vrcp.f32 %v705_v17  ;;  %v718_v23 = vand.u32 2147483648, %v705_v17  ;;  %v716_v25 = vand.u32 2147483647, %v705_v17  ;;  %vm712_vm1 = vweird.f32 %v705_v17 }
 0x177   :  { %v719_v28 = vor.u32 1.1754944e-38, %v718_v23  ;;  %vm717_vm3 = vcmp.eq.f32.partialorder %v716_v25, 8.507059e+37 }
 0x17a   :  { %v871_v18 = vpop.eup %870 }
 0x17b   :  { %v873_v19 = vpop.eup %872  ;;  %v706_v20 = vadd.f32 1.0, %v871_v18 }
 0x17c   :  { %v708_v21 = vmul.f32 %v873_v19, %v705_v17  ;;  %vm713_vm0 = vweird.f32 %v873_v19 }
 0x17d   :  { %874 = vrcp.f32 %v706_v20  ;;  %vm714_vm2 = vmor %vm712_vm1, %vm713_vm0  ;;  %v733_v33 = vand.u32 2147483648, %v706_v20  ;;  %v731_v35 = vand.u32 2147483647, %v706_v20  ;;  %vm727_vm5 = vweird.f32 %v706_v20 }
 0x17e   :  { %v709_v22 = vsub.f32 1.0, %v708_v21 }
 0x17f   :  { %v734_v37 = vor.u32 1.1754944e-38, %v733_v33  ;;  %vm732_vm7 = vcmp.eq.f32.partialorder %v731_v35, 8.507059e+37 }
 0x180   :  { %v710_v24 = vmul.f32 %v873_v19, %v709_v22 }
 0x182   :  { %v711_v26 = vadd.f32 %v873_v19, %v710_v24 }
 0x183   :  { %v875_v27 = vpop.eup %874 }
 0x184   :  { %v715_v29 = vsel %vm714_vm2, %v873_v19, %v711_v26  ;;  %v723_v30 = vmul.f32 %v875_v27, %v706_v20  ;;  %vm728_vm4 = vweird.f32 %v875_v27 }
 0x185   :  { %v720_v31 = vsel %vm717_vm3, %v719_v28, %v715_v29  ;;  %vm729_vm6 = vmor %vm727_vm5, %vm728_vm4 }
 0x186   :  { %789 = vmatmul.f32.vlgmr.msra.gmra.mxu0 %v720_v31  ;;  %v724_v32 = vsub.f32 1.0, %v723_v30 }
 0x188   :  { %v725_v34 = vmul.f32 %v875_v27, %v724_v32 }
 0x18a   :  { %v726_v36 = vadd.f32 %v875_v27, %v725_v34 }
 0x18c   :  { %v730_v38 = vsel %vm729_vm6, %v875_v27, %v726_v36 }
 0x18d   :  { %v735_v39 = vsel %vm732_vm7, %v734_v37, %v730_v38 }
 0x18e   :  { %809 = vmatmul.f32.vlgmr.msra.gmra.mxu1 %v735_v39 }
 0x203   :  { %v790_v41 = vpop.f32.mrf.mxu0 }
 0x204   :  { %v791_v42 = vadd.f32 %v867_v40, %v790_v41 }
 0x20b   :  { %v810_v43 = vpop.f32.mrf.mxu1 }
 0x20c   :  { %v811_v44 = vadd.f32 %v810_v43, %v791_v42 }
 0x20e   :  { %v854_v45 = vmul.f32 -1.442695, %v811_v44 }
 0x210   :  { %876 = vpow2.f32 %v854_v45 }
 0x216   :  { %v877_v46 = vpop.eup %876 }
 0x217   :  { %v816_v47 = vadd.f32 1.0, %v877_v46 }
 0x219   :  { %878 = vrcp.f32 %v816_v47  ;;  %v828_v51 = vand.u32 2147483648, %v816_v47  ;;  %v826_v53 = vand.u32 2147483647, %v816_v47  ;;  %vm822_vm9 = vweird.f32 %v816_v47 }
 0x21b   :  { %v829_v55 = vor.u32 1.1754944e-38, %v828_v51  ;;  %vm827_vm11 = vcmp.eq.f32.partialorder %v826_v53, 8.507059e+37 }
 0x21f   :  { %v879_v48 = vpop.eup %878 }
 0x220   :  { %v818_v49 = vmul.f32 %v879_v48, %v816_v47  ;;  %vm823_vm8 = vweird.f32 %v879_v48 }
 0x221   :  { %vm824_vm10 = vmor %vm822_vm9, %vm823_vm8 }
 0x222   :  { %v819_v50 = vsub.f32 1.0, %v818_v49 }
 0x224   :  { %v820_v52 = vmul.f32 %v879_v48, %v819_v50 }
 0x226   :  { %v821_v54 = vadd.f32 %v879_v48, %v820_v52 }
 0x228   :  { %v825_v56 = vsel %vm824_vm10, %v879_v48, %v821_v54 }
 0x229   :  { %v830_v57 = vsel %vm827_vm11, %v829_v55, %v825_v56 }
 0x22a   :  { %832 = vst [vmem:[#allocation11] sm:$0xff] %v830_v57 }
 0x22b   :  { %843 = dma.vmem_to_hbm [thread:$0]  %s839_s8, 128, %s841_s10, [#allocation4]  }
 0x22c   :  { %1030 = dma.done.wait [#allocation4], 128  }
 0x22d   :  { %1031 = vsyncadd [#allocation4], 4294967168 }
 0x22e   :  { %848 = vsyncpa [#allocation3], 1 }
 0x22f   :  { %849 = vsyncpa [#allocation6], 1 }
 0x230   :  { %850 = vsyncpa [#allocation9], 1 }
 0x231   :  { %851 = vsyncpa [#allocation4], 1 }

</bundles_post_ra>
